<compile_context>
chip_gen: v6e
topology: v6e:2x2x1
jax: 0.10.0
libtpu: 0.0.40
codegen_flags: <defaults>
</compile_context>

<pallas_src>
import functools
import math

import jax
import jax.numpy as jnp
from jax.experimental import pallas as pl
from jax.experimental.pallas import tpu as pltpu

EPS = 1e-8
LRELU_SLOPE = 0.2
FACTORS = [1, 1, 1, 1, 1 / 2, 1 / 4, 1 / 8, 1 / 16, 1 / 32]

_COMPUTE_DTYPE = jnp.bfloat16        # MXU / DMA dtype (accumulation stays f32)


def _round_up(v, m):
    return ((v + m - 1) // m) * m


def _detect_vmem_capacity():
    try:
        cap = int(pltpu.get_tpu_info().vmem_capacity_bytes)
        if cap > 0:
            return cap
    except Exception:
        pass
    return 64 * 1024 * 1024          # conservative (v7x per-TensorCore figure)


_VMEM_CAP = _detect_vmem_capacity()
# 64 MiB scoped limit on 128 MiB parts (v5e/v6e); 32 MiB on 64 MiB parts (v7x)
# and when detection is unavailable.
_VMEM_LIMIT = (64 if _VMEM_CAP >= 128 * 1024 * 1024 else 32) * 1024 * 1024
# Budget for the estimated in-kernel working set of one grid step.
_TILE_BUDGET = _VMEM_LIMIT // 4

# Tri-state switch for the optimized (polyphase + lane-dense-store) conv/fade
# variant: if the local Mosaic build rejects any of its relayouts we fall back
# (once, globally) to the previously validated un-folded variant.
_OPTIMIZED_OK = [True]


def _leaky(x):
    return jnp.where(x > 0, x, LRELU_SLOPE * x)


def _pixnorm(x):
    # PixelNorm over the channel (last / lane) axis, f32 math.
    return x * jax.lax.rsqrt(jnp.mean(x * x, axis=-1, keepdims=True) + EPS)


# ----------------------------------------------------------------------------
# Kernel 1: dense / 1x1-conv kernel (optionally fused PixelNorm + LeakyReLU)
# ----------------------------------------------------------------------------
def _dense_kernel(x_ref, w_ref, b_ref, o_ref, *, pre_pn, lrelu):
    x = x_ref[...]
    if pre_pn:
        # PixelNorm in f32 BEFORE any bf16 cast (matches the PyTorch module).
        x = _pixnorm(x.astype(jnp.float32))
    x = x.astype(w_ref.dtype)
    y = jnp.dot(x, w_ref[...], preferred_element_type=jnp.float32) + b_ref[...]
    if lrelu:
        y = _leaky(y)
    o_ref[...] = y.astype(o_ref.dtype)


def dense_op(x, w, b, *, pre_pn=False, lrelu=False, out_dtype=jnp.float32,
             block_rows=1024):
    """(M, K) @ (K, N) + b with optional fused input-PixelNorm / LeakyReLU."""
    M, K = x.shape
    N = w.shape[1]
    tm = min(block_rows, _round_up(M, 8))
    kernel = functools.partial(_dense_kernel, pre_pn=pre_pn, lrelu=lrelu)
    return pl.pallas_call(
        kernel,
        out_shape=jax.ShapeDtypeStruct((M, N), out_dtype),
        grid=(pl.cdiv(M, tm),),
        in_specs=[pl.BlockSpec((tm, K), lambda i: (i, 0)),
                  pl.BlockSpec((K, N), lambda i: (0, 0)),
                  pl.BlockSpec((1, N), lambda i: (0, 0))],
        out_specs=pl.BlockSpec((tm, N), lambda i: (i, 0)),
        compiler_params=pltpu.CompilerParams(
            dimension_semantics=("parallel",),
            vmem_limit_bytes=_VMEM_LIMIT),
    )(x, w, b.reshape(1, N).astype(jnp.float32))


# ----------------------------------------------------------------------------
# Kernel 2: weight-scaled 3x3 "same" conv, fused LeakyReLU + PixelNorm,
#           optionally fused with a nearest-neighbour 2x upsample of its input
# ----------------------------------------------------------------------------
def _conv3x3_kernel(*refs, upsample, lrelu, pixel_norm, has_halo, optimized):
    if has_halo:
        x_ref, top_ref, bot_ref, w_ref, b_ref, o_ref = refs
    else:
        x_ref, w_ref, b_ref, o_ref = refs

    _, trs, ws, cin = x_ref.shape          # source-resolution tile
    cout = w_ref.shape[-1]

    x = x_ref[0]                           # (trs, ws, cin)
    if has_halo:
        r = pl.program_id(1)
        nr = pl.num_programs(1)
        top = jnp.where(r == 0, jnp.zeros_like(top_ref[0, 0]), top_ref[0, 0])
        bot = jnp.where(r == nr - 1, jnp.zeros_like(bot_ref[0, 0]), bot_ref[0, 0])
    else:
        top = jnp.zeros((ws, cin), x.dtype)
        bot = jnp.zeros((ws, cin), x.dtype)
    rows = jnp.concatenate([top[None], x, bot[None]], axis=0)   # (trs+2, ws, cin)

    def finish(y):                         # y: (M, cout) f32
        y = y + b_ref[...]
        if lrelu:
            y = _leaky(y)
        if pixel_norm:
            y = _pixnorm(y)
        return y.astype(o_ref.dtype)

    if upsample and optimized:
        # Polyphase nearest-2x + 3x3 conv: 4 phase filters with 2x2 support on
        # the half-res input (no repeat buffers, 2.25x fewer MXU FLOPs).
        zc = jnp.zeros((trs + 2, 1, cin), rows.dtype)
        xp = jnp.concatenate([zc, rows, zc], axis=1)            # (trs+2, ws+2, cin)
        colsA = jnp.concatenate([xp[:, 0:ws], xp[:, 1:ws + 1]], axis=-1)
        colsB = jnp.concatenate([xp[:, 1:ws + 1], xp[:, 2:ws + 2]], axis=-1)

        def phase(cols, r0, widx):
            patch = jnp.concatenate([cols[r0:r0 + trs], cols[r0 + 1:r0 + 1 + trs]],
                                    axis=-1).reshape(trs * ws, 4 * cin)
            y = jnp.dot(patch, w_ref[widx], preferred_element_type=jnp.float32)
            return finish(y).reshape(trs, ws, cout)

        y00 = phase(colsA, 0, 0)           # full-res rows 2y,   cols 2x
        y01 = phase(colsB, 0, 1)           # full-res rows 2y,   cols 2x+1
        y10 = phase(colsA, 1, 2)           # full-res rows 2y+1, cols 2x
        y11 = phase(colsB, 1, 3)           # full-res rows 2y+1, cols 2x+1
        # Interleave the 4 phases into a lane-dense (2*trs, 2*ws*cout) slab.
        even = jnp.concatenate([y00, y01], axis=-1).reshape(trs, 2 * ws * cout)
        odd = jnp.concatenate([y10, y11], axis=-1).reshape(trs, 2 * ws * cout)
        full = jnp.concatenate([even[:, None, :], odd[:, None, :]], axis=1)
        o_ref[0] = full.reshape(2 * trs, 2 * ws * cout)
        return

    if upsample:
        # Fallback: materialize the nearest-2x input, dense 3x3 (proven path).
        tro, wo = 2 * trs, 2 * ws
        mid = jnp.repeat(rows[1:trs + 1], 2, axis=0)
        rows = jnp.concatenate([rows[0:1], mid, rows[trs + 1:trs + 2]], axis=0)
        rows = jnp.repeat(rows, 2, axis=1)                      # (tro+2, wo, cin)
    else:
        tro, wo = trs, ws

    zc = jnp.zeros((tro + 2, 1, cin), rows.dtype)
    xp = jnp.concatenate([zc, rows, zc], axis=1)                # (tro+2, wo+2, cin)
    # Build the 3 dx taps once (K = 3*cin), 3 fat MXU matmuls over dy.
    xcols = jnp.concatenate([xp[:, 0:wo], xp[:, 1:wo + 1], xp[:, 2:wo + 2]],
                            axis=-1)                            # (tro+2, wo, 3cin)
    acc = jnp.zeros((tro * wo, cout), jnp.float32)
    for dy in range(3):
        patch = xcols[dy:dy + tro].reshape(tro * wo, 3 * cin)
        acc = acc + jnp.dot(patch, w_ref[dy], preferred_element_type=jnp.float32)
    y = finish(acc)
    if optimized:
        o_ref[0] = y.reshape(tro, wo * cout)                    # lane-dense store
    else:
        o_ref[0] = y.reshape(tro, wo, cout)


def _pick_conv_row_tile(n, h, w, cin, cout, upsample):
    # Budget the REAL in-kernel working set (im2col taps, f32 accumulators,
    # interleave temporaries, double-buffered tiles), not just the tile bytes.
    per_row = w * ((20 * cin + 16 * cout) if upsample else (18 * cin + 12 * cout))
    tr = h
    while tr > 8 and tr * per_row > _TILE_BUDGET:
        tr //= 2
    if n == 1 and tr == h and h >= 16:
        tr = h // 2            # keep both v7x TensorCores busy when batch == 1
    return tr


def _conv_pallas_call(xc, wk, bk, *, n, hs, ws_, cin, cout, h, w, tr, trs,
                      has_halo, upsample, lrelu, pixel_norm, optimized,
                      out_dtype):
    kernel = functools.partial(_conv3x3_kernel, upsample=upsample, lrelu=lrelu,
                               pixel_norm=pixel_norm, has_halo=has_halo,
                               optimized=optimized)
    in_specs = [pl.BlockSpec((1, trs, ws_, cin), lambda b_, r: (b_, r, 0, 0))]
    args = [xc]
    if has_halo:
        in_specs += [
            # one-row top / bottom halos (zeroed in-kernel at image borders)
            pl.BlockSpec((1, 1, ws_, cin),
                         lambda b_, r: (b_, jnp.maximum(r * trs - 1, 0), 0, 0)),
            pl.BlockSpec((1, 1, ws_, cin),
                         lambda b_, r: (b_, jnp.minimum((r + 1) * trs, hs - 1),
                                        0, 0)),
        ]
        args += [xc, xc]
    in_specs += [pl.BlockSpec(wk.shape, lambda b_, r: (0, 0, 0)),
                 pl.BlockSpec((1, cout), lambda b_, r: (0, 0))]
    args += [wk, bk]

    if optimized:
        out_shape = jax.ShapeDtypeStruct((n, h, w * cout), out_dtype)
        out_specs = pl.BlockSpec((1, tr, w * cout), lambda b_, r: (b_, r, 0))
    else:
        out_shape = jax.ShapeDtypeStruct((n, h, w, cout), out_dtype)
        out_specs = pl.BlockSpec((1, tr, w, cout), lambda b_, r: (b_, r, 0, 0))

    out = pl.pallas_call(
        kernel,
        out_shape=out_shape,
        grid=(n, h // tr),
        in_specs=in_specs,
        out_specs=out_specs,
        compiler_params=pltpu.CompilerParams(
            dimension_semantics=("parallel", "parallel"),
            vmem_limit_bytes=_VMEM_LIMIT),
    )(*args)
    return out.reshape(n, h, w, cout)       # metadata-only outside the kernel


def wsconv3x3_op(x, w_torch, b, *, scale, lrelu=True, pixel_norm=True,
                 upsample=False, out_dtype=_COMPUTE_DTYPE):
    """Weight-scaled 3x3 'same' conv (NHWC), fused bias + LeakyReLU +
    PixelNorm, optionally fused with a nearest-2x upsample of its input."""
    n, hs, ws_, cin = x.shape
    cout = w_torch.shape[0]
    h, w = (2 * hs, 2 * ws_) if upsample else (hs, ws_)
    tr = _pick_conv_row_tile(n, h, w, cin, cout, upsample)
    trs = tr // 2 if upsample else tr
    has_halo = (h // tr) > 1

    wt = jnp.transpose(w_torch, (2, 3, 1, 0)).astype(jnp.float32) * float(scale)
    bk = b.reshape(1, cout).astype(jnp.float32)
    xc = x.astype(_COMPUTE_DTYPE)

    def weights(optimized):
        if upsample and optimized:
            # 4 polyphase filters, K ordered (row-tap, col-tap, cin).
            R = jnp.array([[[1., 0., 0.], [0., 1., 1.]],
                           [[1., 1., 0.], [0., 0., 1.]]], jnp.float32)
            F = jnp.einsum('pak,qbl,klio->pqabio', R, R, wt)
            return F.reshape(4, 4 * cin, cout).astype(_COMPUTE_DTYPE)
        return wt.reshape(3, 3 * cin, cout).astype(_COMPUTE_DTYPE)

    common = dict(n=n, hs=hs, ws_=ws_, cin=cin, cout=cout, h=h, w=w, tr=tr,
                  trs=trs, has_halo=has_halo, upsample=upsample, lrelu=lrelu,
                  pixel_norm=pixel_norm, out_dtype=out_dtype)
    if _OPTIMIZED_OK[0]:
        try:
            return _conv_pallas_call(xc, weights(True), bk, optimized=True,
                                     **common)
        except Exception:
            _OPTIMIZED_OK[0] = False
    return _conv_pallas_call(xc, weights(False), bk, optimized=False, **common)


# ----------------------------------------------------------------------------
# Kernel 3: fused tail -- toRGB(hi), toRGB(lo), nearest-2x of the low-res RGB
#           and tanh(alpha*g + (1-alpha)*u), single HBM pass per activation.
# ----------------------------------------------------------------------------
def _rgb_fade_kernel(alpha_ref, hi_ref, lo_ref, w_hi_ref, b_hi_ref,
                     w_lo_ref, b_lo_ref, o_ref, *, fold):
    a = alpha_ref[0]
    _, tr, wo, chi = hi_ref.shape
    _, trs, ws, clo = lo_ref.shape
    img_c = w_hi_ref.shape[-1]
    g = jnp.dot(hi_ref[0].reshape(tr * wo, chi), w_hi_ref[...],
                preferred_element_type=jnp.float32) + b_hi_ref[...]
    u = jnp.dot(lo_ref[0].reshape(trs * ws, clo), w_lo_ref[...],
                preferred_element_type=jnp.float32) + b_lo_ref[...]
    u = u.reshape(trs, ws, img_c)
    u = jnp.repeat(jnp.repeat(u, 2, axis=0), 2, axis=1)     # nearest-2x (tiny, 3ch)
    res = jnp.tanh(a * g.reshape(tr, wo, img_c) + (1.0 - a) * u)
    if fold:
        o_ref[0] = res.reshape(tr, wo * img_c)               # lane-dense store
    else:
        o_ref[0] = res


def _rgb_fade_call(alpha_arr, hi, lo, w_hi, b_hi, w_lo, b_lo, *, tr, fold):
    n, H, W, chi = hi.shape
    _, _Hs, Ws, clo = lo.shape
    img_c = w_hi.shape[-1]
    if fold:
        out_shape = jax.ShapeDtypeStruct((n, H, W * img_c), jnp.float32)
        out_specs = pl.BlockSpec((1, tr, W * img_c), lambda b, r: (b, r, 0))
    else:
        out_shape = jax.ShapeDtypeStruct((n, H, W, img_c), jnp.float32)
        out_specs = pl.BlockSpec((1, tr, W, img_c), lambda b, r: (b, r, 0, 0))
    out = pl.pallas_call(
        functools.partial(_rgb_fade_kernel, fold=fold),
        out_shape=out_shape,
        grid=(n, H // tr),
        in_specs=[
            pl.BlockSpec(memory_space=pltpu.MemorySpace.SMEM),   # alpha scalar
            pl.BlockSpec((1, tr, W, chi), lambda b, r: (b, r, 0, 0)),
            pl.BlockSpec((1, tr // 2, Ws, clo), lambda b, r: (b, r, 0, 0)),
            pl.BlockSpec((chi, img_c), lambda b, r: (0, 0)),
            pl.BlockSpec((1, img_c), lambda b, r: (0, 0)),
            pl.BlockSpec((clo, img_c), lambda b, r: (0, 0)),
            pl.BlockSpec((1, img_c), lambda b, r: (0, 0)),
        ],
        out_specs=out_specs,
        compiler_params=pltpu.CompilerParams(
            dimension_semantics=("parallel", "parallel"),
            vmem_limit_bytes=_VMEM_LIMIT),
    )(alpha_arr, hi, lo, w_hi, b_hi, w_lo, b_lo)
    return out.reshape(n, H, W, img_c)


def rgb_fade_op(alpha, hi, lo, w_hi_t, b_hi, w_lo_t, b_lo):
    n, H, W, chi = hi.shape
    _, _Hs, _Ws, clo = lo.shape
    img_c = w_hi_t.shape[0]
    w_hi = (w_hi_t.reshape(img_c, chi).T
            * math.sqrt(2.0 / chi)).astype(_COMPUTE_DTYPE)
    w_lo = (w_lo_t.reshape(img_c, clo).T
            * math.sqrt(2.0 / clo)).astype(_COMPUTE_DTYPE)
    b_hi2 = b_hi.reshape(1, img_c).astype(jnp.float32)
    b_lo2 = b_lo.reshape(1, img_c).astype(jnp.float32)
    alpha_arr = jnp.asarray(alpha, jnp.float32).reshape(1)

    per_row = W * (4 * chi + 2 * clo + 16 * img_c + 96)
    tr = H
    while tr > 8 and tr * per_row > _TILE_BUDGET:
        tr //= 2
    if n == 1 and tr == H and H >= 16:
        tr = H // 2

    hi_c = hi.astype(_COMPUTE_DTYPE)
    lo_c = lo.astype(_COMPUTE_DTYPE)
    if _OPTIMIZED_OK[0]:
        try:
            return _rgb_fade_call(alpha_arr, hi_c, lo_c, w_hi, b_hi2, w_lo,
                                  b_lo2, tr=tr, fold=True)
        except Exception:
            _OPTIMIZED_OK[0] = False
    return _rgb_fade_call(alpha_arr, hi_c, lo_c, w_hi, b_hi2, w_lo, b_lo2,
                          tr=tr, fold=False)


# ----------------------------------------------------------------------------
# Composite ops (glue)
# ----------------------------------------------------------------------------
def rgb_op(x, w_torch, b):
    # WSConv2d 1x1 ("toRGB"), only used for the steps == 0 path.
    n, h, w, cin = x.shape
    cout = w_torch.shape[0]
    wd = (w_torch.reshape(cout, cin).T
          * math.sqrt(2.0 / cin)).astype(_COMPUTE_DTYPE)
    y = dense_op(x.reshape(n * h * w, cin).astype(_COMPUTE_DTYPE), wd, b,
                 out_dtype=jnp.float32)
    return y.reshape(n, h, w, cout)


def conv_block(x, blk, *, upsample_first):
    x = wsconv3x3_op(x, blk["w1"], blk["b1"], scale=blk["s1"],
                     lrelu=True, pixel_norm=True, upsample=upsample_first)
    x = wsconv3x3_op(x, blk["w2"], blk["b2"], scale=blk["s2"],
                     lrelu=True, pixel_norm=True, upsample=False)
    return x


# ----------------------------------------------------------------------------
# Parameter init (deterministic, matches shapes of the PyTorch module)
# ----------------------------------------------------------------------------
def init_generator_params(key, z_dim, in_channels, img_channels, num_blocks):
    keys = jax.random.split(key, 3 + 3 * num_blocks)
    it = iter(keys)
    params = {}
    params["ct_w"] = jax.random.normal(next(it), (z_dim, in_channels, 4, 4),
                                       jnp.float32) * 0.05
    params["ct_b"] = jnp.zeros((in_channels,), jnp.float32)
    params["init_conv_w"] = jax.random.normal(next(it),
                                              (in_channels, in_channels, 3, 3),
                                              jnp.float32)
    params["init_conv_b"] = jnp.zeros((in_channels,), jnp.float32)
    params["init_conv_s"] = math.sqrt(2.0 / (in_channels * 9))
    rgb_w = [jax.random.normal(next(it), (img_channels, in_channels, 1, 1),
                               jnp.float32)]
    rgb_b = [jnp.zeros((img_channels,), jnp.float32)]
    blocks = []
    for i in range(num_blocks):
        cin = int(in_channels * FACTORS[i])
        cout = int(in_channels * FACTORS[i + 1])
        k1, k2, k3 = jax.random.split(jax.random.fold_in(key, 1000 + i), 3)
        blocks.append(dict(
            w1=jax.random.normal(k1, (cout, cin, 3, 3), jnp.float32),
            b1=jnp.zeros((cout,), jnp.float32),
            s1=math.sqrt(2.0 / (cin * 9)),
            w2=jax.random.normal(k2, (cout, cout, 3, 3), jnp.float32),
            b2=jnp.zeros((cout,), jnp.float32),
            s2=math.sqrt(2.0 / (cout * 9)),
        ))
        rgb_w.append(jax.random.normal(k3, (img_channels, cout, 1, 1),
                                       jnp.float32))
        rgb_b.append(jnp.zeros((img_channels,), jnp.float32))
    params["blocks"] = blocks
    params["rgb_w"] = rgb_w
    params["rgb_b"] = rgb_b
    return params


# ----------------------------------------------------------------------------
# Generator forward (output layout NHWC)
# ----------------------------------------------------------------------------
def generator_forward(params, x, alpha, steps):
    # x: (N, z_dim, 1, 1)  (same convention as the PyTorch module)
    n, z_dim = x.shape[0], x.shape[1]
    in_channels = params["ct_b"].shape[0]

    # initial: PixelNorm -> ConvTranspose2d(4,1,0) -> LeakyReLU.  With a 1x1
    # input the transposed conv is exactly a dense layer.
    xf = x.reshape(n, z_dim)                    # f32, PixelNorm done in-kernel
    wd = params["ct_w"].reshape(z_dim, in_channels * 16).astype(_COMPUTE_DTYPE)
    bd = jnp.repeat(params["ct_b"], 16)
    y = dense_op(xf, wd, bd, pre_pn=True, lrelu=True, out_dtype=_COMPUTE_DTYPE)
    out = y.reshape(n, in_channels, 4, 4).transpose(0, 2, 3, 1)   # NHWC

    # -> WSConv2d(3x3) -> LeakyReLU -> PixelNorm
    out = wsconv3x3_op(out, params["init_conv_w"], params["init_conv_b"],
                       scale=params["init_conv_s"], lrelu=True,
                       pixel_norm=True, upsample=False)

    if steps == 0:
        return rgb_op(out, params["rgb_w"][0], params["rgb_b"][0])

    prev = out
    for step in range(steps):
        prev = out
        out = conv_block(out, params["blocks"][step], upsample_first=True)

    # rgb(upsample(prev)) == upsample(rgb(prev)) for a 1x1 conv; the fused tail
    # kernel upsamples only the 3-channel RGB image, in-register.
    return rgb_fade_op(alpha, out, prev,
                       params["rgb_w"][steps], params["rgb_b"][steps],
                       params["rgb_w"][steps - 1], params["rgb_b"][steps - 1])


# ----------------------------------------------------------------------------
if __name__ == "__main__":
    key = jax.random.PRNGKey(0)
    z_dim, in_channels, img_channels = 32, 16, 3
    batch, steps, alpha = 2, 2, 0.6

    params = init_generator_params(key, z_dim, in_channels, img_channels,
                                   num_blocks=steps)
    x = jax.random.normal(jax.random.fold_in(key, 777),
                          (batch, z_dim, 1, 1), jnp.float32)

    out = generator_forward(params, x, alpha, steps)
    out = jax.block_until_ready(out)

    expected_hw = 4 * (2 ** steps)               # 4x4 base, doubled per step
    assert out.shape == (batch, expected_hw, expected_hw, img_channels), out.shape
    assert bool(jnp.all(jnp.isfinite(out)))
    print("KERNEL_OK")
</pallas_src>

<mosaic_0001>
module attributes {stable_mosaic.version = 11 : i64} {
  func.func @_dense_kernel(%arg0: i32, %arg1: memref<8x32xf32, #tpu.memory_space<vmem>>, %arg2: memref<32x256xbf16, #tpu.memory_space<vmem>>, %arg3: memref<1x256xf32, #tpu.memory_space<vmem>>, %arg4: memref<8x256xbf16, #tpu.memory_space<vmem>>) attributes {dimension_semantics = [#tpu.dimension_semantics<parallel>], iteration_bounds = array<i64: 1>, scalar_prefetch = 0 : i64, scratch_operands = 0 : i64, tpu.core_type = #tpu.core_type<tc>, window_params = [{transform_indices = @transform_0, window_bounds = array<i64: 8, 32>}, {pipeline_mode = #tpu.pipeline_mode<synchronous>, transform_indices = @transform_1, window_bounds = array<i64: 32, 256>}, {pipeline_mode = #tpu.pipeline_mode<synchronous>, transform_indices = @transform_2, window_bounds = array<i64: 1, 256>}, {transform_indices = @transform_3, window_bounds = array<i64: 8, 256>}]} {
    %c0 = arith.constant 0 : index
    %c0_0 = arith.constant 0 : index
    %0 = vector.load %arg1[%c0, %c0_0] : memref<8x32xf32, #tpu.memory_space<vmem>>, vector<8x32xf32>
    %1 = arith.mulf %0, %0 : vector<8x32xf32>
    %cst = arith.constant dense<0.000000e+00> : vector<8xf32>
    %2 = vector.multi_reduction <add>, %1, %cst [1] : vector<8x32xf32> to vector<8xf32>
    %3 = vector.shape_cast %2 : vector<8xf32> to vector<8x1xf32>
    %cst_1 = arith.constant 3.200000e+01 : f32
    %4 = vector.broadcast %cst_1 : f32 to vector<8x1xf32>
    %5 = arith.divf %3, %4 : vector<8x1xf32>
    %cst_2 = arith.constant 9.99999993E-9 : f32
    %6 = vector.broadcast %cst_2 : f32 to vector<8x1xf32>
    %7 = arith.addf %5, %6 : vector<8x1xf32>
    %8 = math.rsqrt %7 : vector<8x1xf32>
    %9 = vector.broadcast %8 : vector<8x1xf32> to vector<8x32xf32>
    %10 = arith.mulf %0, %9 : vector<8x32xf32>
    %11 = arith.truncf %10 : vector<8x32xf32> to vector<8x32xbf16>
    %c0_3 = arith.constant 0 : index
    %c0_4 = arith.constant 0 : index
    %12 = vector.load %arg2[%c0_3, %c0_4] : memref<32x256xbf16, #tpu.memory_space<vmem>>, vector<32x256xbf16>
    %cst_5 = arith.constant dense<0.000000e+00> : vector<8x256xf32>
    %13 = tpu.matmul %11, %12, %cst_5 {dimension_numbers = #tpu.dot_dimension_numbers<[1], [0], [0], [1], [0, 0, 1, 1], [], []>} : vector<8x32xbf16>, vector<32x256xbf16>, vector<8x256xf32> -> vector<8x256xf32>
    %c0_6 = arith.constant 0 : index
    %c0_7 = arith.constant 0 : index
    %14 = vector.load %arg3[%c0_6, %c0_7] : memref<1x256xf32, #tpu.memory_space<vmem>>, vector<1x256xf32>
    %15 = vector.broadcast %14 : vector<1x256xf32> to vector<8x256xf32>
    %16 = arith.addf %13, %15 : vector<8x256xf32>
    %cst_8 = arith.constant 0.000000e+00 : f32
    %17 = vector.broadcast %cst_8 : f32 to vector<8x256xf32>
    %18 = arith.cmpf ogt, %16, %17 : vector<8x256xf32>
    %cst_9 = arith.constant 2.000000e-01 : f32
    %19 = vector.broadcast %cst_9 : f32 to vector<8x256xf32>
    %20 = arith.mulf %19, %16 : vector<8x256xf32>
    %21 = arith.select %18, %16, %20 : vector<8x256xi1>, vector<8x256xf32>
    %22 = arith.truncf %21 : vector<8x256xf32> to vector<8x256xbf16>
    %c0_10 = arith.constant 0 : index
    %c0_11 = arith.constant 0 : index
    %23 = vector.load %arg4[%c0_10, %c0_11] : memref<8x256xbf16, #tpu.memory_space<vmem>>, vector<8x256xbf16>
    tpu.vector_store %arg4[%c0_10, %c0_11], %22 {strides = array<i32>} : memref<8x256xbf16, #tpu.memory_space<vmem>>, vector<8x256xbf16>,
    return
  }
  func.func @transform_0(%arg0: i32) -> (i32, i32) {
    %c0_i32 = arith.constant 0 : i32
    %c0_i32_0 = arith.constant 0 : i32
    return %arg0, %c0_i32 : i32, i32
  }
  func.func @transform_1(%arg0: i32) -> (i32, i32) {
    %c0_i32 = arith.constant 0 : i32
    %c0_i32_0 = arith.constant 0 : i32
    %c0_i32_1 = arith.constant 0 : i32
    return %c0_i32, %c0_i32_0 : i32, i32
  }
  func.func @transform_2(%arg0: i32) -> (i32, i32) {
    %c0_i32 = arith.constant 0 : i32
    %c0_i32_0 = arith.constant 0 : i32
    %c0_i32_1 = arith.constant 0 : i32
    return %c0_i32, %c0_i32_0 : i32, i32
  }
  func.func @transform_3(%arg0: i32) -> (i32, i32) {
    %c0_i32 = arith.constant 0 : i32
    %c0_i32_0 = arith.constant 0 : i32
    return %arg0, %c0_i32 : i32, i32
  }
}

</mosaic_0001>

<bundles_post_ra>
// kernel: tpu_custom_call.1
= control target key start
LH: loop header
LB: loop body
LE: loop exit
PB: predicated region body
PF: predicated region fallthrough
CT: control target
= control target key end

     0   :  { %8 = vsyncpa [#allocation3], 0  ;;  %s337_s0 = inlined_call_operand.hbm [shape: f32[2,32], index: 0, kind: input, shape index: {}]   ;;  %s338_s1 = inlined_call_operand.hbm [shape: bf16[32,256], index: 1, kind: input, shape index: {}]   ;;  %s339_s2 = inlined_call_operand.vmem [shape: f32[1,256], index: 2, kind: input, shape index: {}]   ;;  %s340_s3 = inlined_call_operand.hbm [shape: bf16[2,256], index: 3, kind: output, shape index: {}]  }
   0x1   :  { %9 = vsyncpa [#allocation6], 0 }
   0x2   :  { %10 = vsyncpa [#allocation4], 0 }
   0x3   :  { %15 = vsyncadd [#allocation3], 96  ;;  %s288_s12 = smov [#allocation2]  }
   0x4   :  { %s16_s13 = sshll.u32 %s288_s12, 4  ;;  %s17_s13 = int_to_ptr.vmem [resolvable:$true] %s16_s13 }
   0x5   :  { %s230_s14 = scalar_lea.vmem %s17_s13, 32  ;;  %s234_s15 = scalar_lea.vmem %s17_s13, 128 }
   0x6   :  { %p231_p0 = scmp.ne.s32.totalorder %s17_s13, %s230_s14  ;;  %p235_p1 = scmp.lt.s32.totalorder %s17_s13, %s17_s13 }
   0x7   :  { %p236_p2 = scmp.lt.s32.totalorder %s234_s15, %s230_s14 }
   0x9   :  { %p237_p3 = por %p236_p2, %p235_p1 }
   0xb   :  { %p238_p4 = pnand %p237_p3, %p231_p0 }
   0xd   :  { %241 = shalt.err (!%p238_p4)
}
   0xe   :  { %s289_s16 = smov 32   ;;  %s290_s17 = smov 2  }
   0xf   :  { %22 = dma.hbm_to_vmem [thread:$0]  %s337_s0, 32, %s17_s13, [#allocation3], %s289_s16, %s289_s16, %s290_s17  }
  0x10   :  { %s291_s20 = smov [#allocation5]  }
  0x11   :  { %s28_s21 = sshll.u32 %s291_s20, 4  ;;  %s29_s21 = int_to_ptr.vmem [resolvable:$true] %s28_s21 }
  0x12   :  { %s250_s22 = scalar_lea.vmem %s29_s21, 512  ;;  %p255_p6 = scmp.lt.s32.totalorder %s29_s21, %s29_s21 }
  0x13   :  { %p251_p5 = scmp.ne.s32.totalorder %s29_s21, %s250_s22  ;;  %p256_p7 = scmp.lt.s32.totalorder %s250_s22, %s250_s22 }
  0x15   :  { %p257_p8 = por %p256_p7, %p255_p6 }
  0x17   :  { %p258_p9 = pnand %p257_p8, %p251_p5 }
  0x19   :  { %261 = shalt.err (!%p258_p9)
}
  0x1a   :  { %s292_s23 = smov 128   ;;  %s293_s24 = smov 8  }
  0x1b   :  { %34 = dma.hbm_to_vmem [thread:$0]  %s338_s1, 512, %s29_s21, [#allocation6], %s292_s23, %s292_s23, %s293_s24  }
  0x1c   :  { %282 = dma.done.wait [#allocation3], 128  }
  0x1d   :  { %283 = vsyncadd [#allocation3], 4294967168 }
  0x1e   :  { %284 = dma.done.wait [#allocation6], 512  }
  0x1f   :  { %285 = vsyncadd [#allocation6], 4294966784  ;;  %v44_v0 = vld [vmem:[#allocation2] sm:$0xff]  ;;  %vm46_vm0 = vcmask 261120   ;;  %v217_v5 = vld [vmem:[#allocation5 + $0x4] ss:$8 sps:$4 sm:$0xff]   ;;  %v62_v14 = vlaneseq }
  0x20   :  { %v45_v1 = vmul.f32 %v44_v0, %v44_v0  ;;  %v214_v3 = vld [vmem:[#allocation5 + $0x14] ss:$8 sps:$4 sm:$0xff]   ;;  %v216_v4 = vld [vmem:[#allocation5 + $0x10] ss:$8 sps:$4 sm:$0xff]   ;;  %v294_v6 = vmov 0  }
  0x21   :  { %107 = vmatprep.subr.bf16.mxu0 %v214_v3  ;;  %127 = vmatprep.mubr.bf16.mxu0 %v294_v6  ;;  %v219_v7 = vld [vmem:[#allocation5] ss:$8 sps:$4 sm:$0xff]   ;;  %v63_v15 = vshrl.u32 %v62_v14, 7  ;;  %v60_v17 = vld [vmem:[%s339_s2] sm:$0x3] }
  0x22   :  { %v47_v2 = vsel %vm46_vm0, %v45_v1, 0.0  ;;  %108 = vmatpush1.bf16.msra.mxu0 %v216_v4  ;;  %v295_v20 = vmov 1966171168  }
  0x23   :  { %48 = vadd.xlane.f32.xlu0 %v47_v2  ;;  %109 = vmatprep.subr.bf16.mxu0 %v217_v5  ;;  %v64_v16 = vsub.s32 0, %v63_v15  ;;  %v68_v18 = vsub.s32 1, %v63_v15  ;;  %v148_v21 = vunpack.c.l.s4 %v295_v20 }
  0x25   :  { %v65_v19 = vrot.slane %v60_v17, %v64_v16  ;;  %v69_v22 = vrot.slane %v60_v17, %v68_v18  ;;  %v149_v26 = vunpack.c.0.s8 %v148_v21 }
  0x26   :  { %110 = vmatpush1.bf16.msra.mxu0 %v219_v7 }
  0x27   :  { %v152_v31 = vsub.s32 %v149_v26, %v63_v15 }
  0xac   :  { %v49_v8 = vpop.xlane.xlu0 %48 }
  0xad   :  { %v51_v9 = vmul.f32 0.03125, %v49_v8 }
  0xaf   :  { %v52_v10 = vadd.f32 1e-08, %v51_v9 }
  0xb1   :  { %220 = vrsqrt.f32 %v52_v10 }
  0xbe   :  { %v221_v11 = vpop.eup %220 }
  0xbf   :  { %v54_v12 = vmul.f32 %v221_v11, %v44_v0 }
  0xc1   :  { %v55_v13 = vpack.c.bf16 %v54_v12, %v54_v12 }
  0xc3   :  { %201 = vmatmul.mubr.msk.bf16.vlgmr.msra.gmra.mxu0 %vm46_vm0, %v55_v13 }
 0x183   :  { %v129_v23 = vpop.f32.mrf.mxu0 }
 0x184   :  { %v130_v24 = vadd.f32 %v129_v23, %v65_v19 }
 0x185   :  { %v131_v25 = vpop.f32.mrf.mxu0 }
 0x186   :  { %v138_v27 = vmul.f32 0.2, %v130_v24  ;;  %v132_v28 = vadd.f32 %v131_v25, %v69_v22  ;;  %vm136_vm1 = vcmp.gt.f32.partialorder %v130_v24, 0.0 }
 0x187   :  { %v133_v29 = vpop.f32.mrf.mxu0 }
 0x188   :  { %vm137_vm2 = vcmp.gt.f32.partialorder %v132_v28, 0.0  ;;  %v139_v30 = vmul.f32 0.2, %v132_v28  ;;  %v140_v33 = vsel %vm136_vm1, %v130_v24, %v138_v27 }
 0x189   :  { %v134_v32 = vpop.f32.mrf.mxu0 }
 0x18a   :  { %v141_v34 = vsel %vm137_vm2, %v132_v28, %v139_v30 }
 0x18b   :  { %v202_v35 = vpack.c.bf16 %v141_v34, %v140_v33 }
 0x18d   :  { %v153_v36 = vrot.slane %v202_v35, %v152_v31 }
 0x18f   :  { %v154_v37 = vcombine.high %v153_v36, %v153_v36  ;;  %v161_v38 = vrot.slane %v153_v36, %v152_v31  ;;  %203 = vst.sshfl [vmem:[#allocation7] sm:$0x5 pattern:$0x73625140] %v153_v36 }
 0x191   :  { %v168_v39 = vrot.slane %v154_v37, %v152_v31  ;;  %v169_v40 = vcombine.high %v161_v38, %v161_v38  ;;  %204 = vst.sshfl [vmem:[#allocation7 + $0x2] sm:$0x5 pattern:$0x73625140] %v154_v37 }
 0x193   :  { %v170_v41 = vcombine.high %v168_v39, %v168_v39  ;;  %177 = vst [vmem:[#allocation7 + $0x4] sm:$0x3] %v169_v40 }
 0x195   :  { %178 = vst [vmem:[#allocation7 + $0x6] sm:$0x3] %v170_v41 }
 0x196   :  { %183 = vsyncadd [#allocation4], 96  ;;  %s296_s2 = smov [#allocation7]  }
 0x197   :  { %s184_s27 = sshll.u32 %s296_s2, 4  ;;  %s185_s27 = int_to_ptr.vmem [resolvable:$true] %s184_s27 }
 0x198   :  { %s262_s28 = scalar_lea.vmem %s185_s27, 32  ;;  %s266_s29 = scalar_lea.vmem %s185_s27, 128 }
 0x199   :  { %p263_p10 = scmp.ne.s32.totalorder %s185_s27, %s262_s28  ;;  %p267_p11 = scmp.lt.s32.totalorder %s185_s27, %s185_s27 }
 0x19a   :  { %p268_p12 = scmp.lt.s32.totalorder %s266_s29, %s262_s28 }
 0x19c   :  { %p269_p13 = por %p268_p12, %p267_p11 }
 0x19e   :  { %p270_p0 = pnand %p269_p13, %p263_p10 }
 0x1a0   :  { %273 = shalt.err (!%p270_p0)
}
 0x1a1   :  { %190 = dma.vmem_to_hbm [thread:$0]  %s185_s27, 32, %s340_s3, [#allocation4], %s289_s16, %s289_s16, %s290_s17  }
 0x1a2   :  { %286 = dma.done.wait [#allocation4], 128  }
 0x1a3   :  { %287 = vsyncadd [#allocation4], 4294967168 }
 0x1a4   :  { %194 = vsyncpa [#allocation3], 1 }
 0x1a5   :  { %195 = vsyncpa [#allocation6], 1 }
 0x1a6   :  { %196 = vsyncpa [#allocation4], 1 }

</bundles_post_ra>
